<compile_context>
chip_gen: v6e
topology: v6e:2x2x1
jax: 0.10.0
libtpu: 0.0.40
codegen_flags: <defaults>
</compile_context>

<pallas_src>
import math
from functools import partial

import jax
import jax.numpy as jnp
from jax import lax
from jax.experimental import pallas as pl
from jax.experimental.pallas import tpu as pltpu

# Deterministic, in-script hyperparameters (module __init__ kwargs).
ALPHA = 0.3          # Tversky false-positive weight
BETA = 0.7           # Tversky false-negative weight
SMOOTH = 1e-5
WEIGHT_CE = 1.0
WEIGHT_TVERSKY = 1.0
# ignore_label=None -> the masking branch of forward() is never taken.


def _round_up(x, m):
    return ((x + m - 1) // m) * m


def _num_tensorcores():
    """Best-effort TensorCores-per-chip query (1 on v5e/v6e, 2 on v7x)."""
    try:
        info = pltpu.get_tpu_info()
    except Exception:
        return 1
    for attr in ("num_cores", "num_tensorcores", "tensorcore_count", "cores_per_chip"):
        v = getattr(info, attr, None)
        if isinstance(v, int) and 1 <= v <= 8:
            return v
    return 1


def _vmem_block_bytes(B, C, tn, in_dtype):
    """Rough per-grid-step VMEM footprint (padded layouts, double-buffered
    inputs, ~12 full-size f32 temporaries for the elementwise chain)."""
    isz = jnp.dtype(in_dtype).itemsize
    pack = max(1, 4 // isz)                 # rows packed per 32-bit sublane word
    c_in = _round_up(C, 8 * pack)           # bf16 -> 16-sublane tiles, f32 -> 8
    x_buf = B * c_in * tn * isz
    lab_buf = B * 8 * tn * 4                # (B,1,tn) int32, sublane dim padded to 8
    c_f32 = _round_up(C, 8)
    temps = 12 * B * c_f32 * tn * 4
    return 2 * (x_buf + lab_buf) + temps


def _auto_tile_n(B, C, in_dtype, budget_bytes=40 << 20):
    """~1 MiB of raw logits per step, shrunk until the padded footprint fits the
    VMEM budget (budget chosen to also fit v7x's 64 MiB per-TC VMEM)."""
    isz = jnp.dtype(in_dtype).itemsize
    tn = max(512, _round_up((1 << 20) // max(1, B * C * isz), 128))
    while tn > 512 and _vmem_block_bytes(B, C, tn, in_dtype) > budget_bytes:
        tn //= 2
    return tn


def _make_kernel(B, C, N, tn, nt_total, ntpc, has_ragged, any_dup):
    rem = N - (nt_total - 1) * tn      # valid lanes in the last real tile

    def kernel(x_ref, t_ref, tp_ref, sp_ref, cnt_ref, ce_ref):
        core = pl.program_id(0)
        step = pl.program_id(1)

        # Zero the resident accumulators at the start of each core's chunk.
        @pl.when(step == 0)
        def _init():
            tp_ref[...] = jnp.zeros_like(tp_ref)
            sp_ref[...] = jnp.zeros_like(sp_ref)
            cnt_ref[...] = jnp.zeros_like(cnt_ref)
            ce_ref[...] = jnp.zeros_like(ce_ref)

        gi = core * ntpc + step                                   # global tile index
        cls = lax.broadcasted_iota(jnp.int32, (1, C, 1), 1)       # class iota

        def accumulate(valid):
            x_t = x_ref[...].astype(jnp.float32)                  # (B, C, tn)
            lab = t_ref[...].astype(jnp.int32)                    # (B, 1, tn)
            if valid is not None:
                # Zero the OOB tail *before* exp so garbage can't make inf/NaN.
                x_t = jnp.where(valid, x_t, 0.0)

            # softmax over the channel (sublane) axis
            m = jnp.max(x_t, axis=1, keepdims=True)
            e = jnp.exp(x_t - m)
            s = jnp.sum(e, axis=1, keepdims=True)
            inv = pl.reciprocal(s, approx=True)                   # EUP slot
            inv = inv * (2.0 - s * inv)                           # Newton step ~ exact
            p = e * inv                                           # (B, C, tn)
            lse = jnp.log(s) + m                                  # (B, 1, tn)

            eq = cls == lab                                       # one-hot as a select mask
            if valid is not None:
                eq = jnp.logical_and(eq, valid)
            p_oh = jnp.where(eq, p, 0.0)                          # for tp
            x_lab = jnp.sum(jnp.where(eq, x_t, 0.0), axis=1, keepdims=True)
            ce_vox = lse - x_lab                                  # fused per-voxel CE
            if valid is not None:
                p_src = jnp.where(valid, p, 0.0)
                ce_vox = jnp.where(valid, ce_vox, 0.0)
            else:
                p_src = p

            # Per-(B, C) partial sums; fp/fn recovered algebraically at finalize:
            #   fp = sum(p) - tp ,  fn = count - tp
            tp_ref[...] += jnp.sum(p_oh, axis=2)
            sp_ref[...] += jnp.sum(p_src, axis=2)
            cnt_ref[...] += jnp.sum(jnp.where(eq, 1.0, 0.0), axis=2)
            ce_ref[...] += jnp.sum(ce_vox, axis=2)

        if has_ragged:
            # Interior (full) tiles: no masking work at all.
            @pl.when(gi < nt_total - 1)
            def _full():
                accumulate(None)

            # Last real tile: lane mask for the ragged tail. Duplicate tiles
            # (gi >= nt_total, from an odd per-core split) contribute nothing.
            @pl.when(gi == nt_total - 1)
            def _edge():
                lane = lax.broadcasted_iota(jnp.int32, (1, 1, tn), 2)
                accumulate(lane < rem)
        elif any_dup:
            @pl.when(gi < nt_total)
            def _full():
                accumulate(None)
        else:
            accumulate(None)

    return kernel


@partial(jax.jit, static_argnames=("tile_n",))
def tversky_and_ce_loss(net_output, target, *, tile_n=None):
    """net_output: (B, C, *spatial) logits (any float dtype, bf16 preferred);
       target:     (B, 1, *spatial) integer class labels in [0, C)."""
    B, C = net_output.shape[:2]
    N = math.prod(net_output.shape[2:])

    # Logits stay in their native dtype (upcast to f32 inside the kernel);
    # labels stream as int32 (no extra cast pass, no C>127 hazard).
    x = net_output.reshape(B, C, N)
    t = target.reshape(B, 1, N).astype(jnp.int32)   # no-op when already int32

    # --- tiling over the flattened spatial axis N (lane axis) ---
    if tile_n is None:
        tile_n = _auto_tile_n(B, C, x.dtype)
    tn = min(_round_up(int(tile_n), 128), _round_up(N, 128))
    if tn >= N:
        tn = N                      # single full-extent block, no masking needed
    nt_total = -(-N // tn)          # number of real N-tiles
    nc = max(1, min(_num_tensorcores(), nt_total))   # leading 'parallel' axis
    ntpc = -(-nt_total // nc)       # tiles per core
    has_ragged = (N % tn) != 0
    any_dup = nc * ntpc > nt_total  # fully-OOB duplicate tiles from an odd split

    last = nt_total - 1
    if any_dup:
        in_idx = lambda c, i: (0, 0, jnp.minimum(c * ntpc + i, last))
    else:
        in_idx = lambda c, i: (0, 0, c * ntpc + i)

    kernel = _make_kernel(B, C, N, tn, nt_total, ntpc, has_ragged, any_dup)

    bc_spec = pl.BlockSpec((None, B, C), lambda c, i: (c, 0, 0))
    ce_spec = pl.BlockSpec((None, B, 1), lambda c, i: (c, 0, 0))

    vmem_limit = int(min(56 << 20,
                         max(32 << 20, 1.25 * _vmem_block_bytes(B, C, tn, x.dtype))))

    tp_p, sp_p, cnt_p, ce_p = pl.pallas_call(
        kernel,
        out_shape=(
            jax.ShapeDtypeStruct((nc, B, C), jnp.float32),   # tp
            jax.ShapeDtypeStruct((nc, B, C), jnp.float32),   # sum(p)
            jax.ShapeDtypeStruct((nc, B, C), jnp.float32),   # label count
            jax.ShapeDtypeStruct((nc, B, 1), jnp.float32),   # CE partial sum
        ),
        grid_spec=pltpu.PrefetchScalarGridSpec(
            num_scalar_prefetch=0,
            grid=(nc, ntpc),
            in_specs=[
                pl.BlockSpec((B, C, tn), in_idx),
                pl.BlockSpec((B, 1, tn), in_idx),
            ],
            out_specs=(bc_spec, bc_spec, bc_spec, ce_spec),
        ),
        compiler_params=pltpu.CompilerParams(
            dimension_semantics=("parallel", "arbitrary"),
            vmem_limit_bytes=vmem_limit),
    )(x, t)

    # Tiny finalize (O(B*C) scalar math): combine per-core partials, form the
    # Tversky index and CE mean, then the weighted sum.
    tp = jnp.sum(tp_p, axis=0)
    sp = jnp.sum(sp_p, axis=0)
    cnt = jnp.sum(cnt_p, axis=0)

    fp = sp - tp
    fn = cnt - tp
    tversky = (tp + SMOOTH) / (tp + ALPHA * fp + BETA * fn + SMOOTH)
    tversky_loss = -jnp.mean(tversky[:, 1:])          # do_bg=False: drop background
    ce_loss = jnp.sum(ce_p) / (B * N)                 # mean over all voxels

    return WEIGHT_CE * ce_loss + WEIGHT_TVERSKY * tversky_loss


def _reference_loss(net_output, target):
    """Pure-JAX reference mirroring the PyTorch module (for a sanity check)."""
    B, C = net_output.shape[:2]
    x = net_output.reshape(B, C, -1).astype(jnp.float32)
    t = target.reshape(B, 1, -1).astype(jnp.int32)
    p = jax.nn.softmax(x, axis=1)
    oh = (jnp.arange(C)[None, :, None] == t).astype(jnp.float32)
    tp = jnp.sum(p * oh, axis=2)
    fp = jnp.sum(p * (1.0 - oh), axis=2)
    fn = jnp.sum((1.0 - p) * oh, axis=2)
    tversky = (tp + SMOOTH) / (tp + ALPHA * fp + BETA * fn + SMOOTH)
    tversky_loss = -jnp.mean(tversky[:, 1:])
    logp = jax.nn.log_softmax(x, axis=1)
    ce = -jnp.mean(jnp.sum(logp * oh, axis=1))
    return WEIGHT_CE * ce + WEIGHT_TVERSKY * tversky_loss


if __name__ == "__main__":
    key = jax.random.PRNGKey(0)
    k1, k2 = jax.random.split(key)
    # target must be b, c, z, y, x with c = 1  (per the module docstring)
    B, C, Z, Y, X = 2, 4, 4, 10, 16          # N = 640 voxels
    net_output = jax.random.normal(k1, (B, C, Z, Y, X), dtype=jnp.float32)
    net_output = net_output.astype(jnp.bfloat16)     # typical training dtype
    target = jax.random.randint(k2, (B, 1, Z, Y, X), 0, C, dtype=jnp.int32)

    ref = _reference_loss(net_output, target)

    # Small tile -> exercises the multi-tile reduction grid, the in-kernel
    # ragged-tail mask (640 % 256 != 0) and (on v7x) the 2-core split.
    loss_tiled = tversky_and_ce_loss(net_output, target, tile_n=256)
    jax.block_until_ready(loss_tiled)
    assert jnp.allclose(loss_tiled, ref, rtol=1e-4, atol=1e-4), (loss_tiled, ref)

    # Auto tile -> single full-extent block, clean (unmasked) path.
    loss_default = tversky_and_ce_loss(net_output, target)
    jax.block_until_ready(loss_default)
    assert jnp.allclose(loss_default, ref, rtol=1e-4, atol=1e-4), (loss_default, ref)

    print("KERNEL_OK")
</pallas_src>

<mosaic_0001>
module attributes {stable_mosaic.version = 11 : i64} {
  func.func @kernel(%arg0: i32, %arg1: i32, %arg2: memref<2x4x256xbf16, #tpu.memory_space<vmem>>, %arg3: memref<2x1x256xi32, #tpu.memory_space<vmem>>, %arg4: memref<1x2x4xf32, #tpu.memory_space<vmem>>, %arg5: memref<1x2x4xf32, #tpu.memory_space<vmem>>, %arg6: memref<1x2x4xf32, #tpu.memory_space<vmem>>, %arg7: memref<1x2x1xf32, #tpu.memory_space<vmem>>) attributes {dimension_semantics = [#tpu.dimension_semantics<parallel>, #tpu.dimension_semantics<arbitrary>], iteration_bounds = array<i64: 1, 3>, scalar_prefetch = 0 : i64, scratch_operands = 0 : i64, tpu.core_type = #tpu.core_type<tc>, window_params = [{transform_indices = @transform_0, window_bounds = array<i64: 2, 4, 256>}, {transform_indices = @transform_1, window_bounds = array<i64: 2, 1, 256>}, {transform_indices = @transform_2, window_bounds = array<i64: 1, 2, 4>}, {transform_indices = @transform_3, window_bounds = array<i64: 1, 2, 4>}, {transform_indices = @transform_4, window_bounds = array<i64: 1, 2, 4>}, {transform_indices = @transform_5, window_bounds = array<i64: 1, 2, 1>}]} {
    %c0_i32 = arith.constant 0 : i32
    %0 = arith.cmpi eq, %arg1, %c0_i32 : i32
    %1 = arith.extui %0 : i1 to i32
    %c0_i32_0 = arith.constant 0 : i32
    %2 = arith.cmpi ne, %1, %c0_i32_0 : i32
    scf.if %2 {
      %cst = arith.constant 0.000000e+00 : f32
      %12 = vector.broadcast %cst : f32 to vector<2x4xf32>
      %c0 = arith.constant 0 : index
      %c0_4 = arith.constant 0 : index
      %c0_5 = arith.constant 0 : index
      %13 = vector.load %arg4[%c0, %c0_4, %c0_5] : memref<1x2x4xf32, #tpu.memory_space<vmem>>, vector<1x2x4xf32>
      %14 = vector.shape_cast %13 : vector<1x2x4xf32> to vector<2x4xf32>
      %15 = vector.shape_cast %12 : vector<2x4xf32> to vector<1x2x4xf32>
      tpu.vector_store %arg4[%c0, %c0_4, %c0_5], %15 {strides = array<i32>} : memref<1x2x4xf32, #tpu.memory_space<vmem>>, vector<1x2x4xf32>,
      %cst_6 = arith.constant 0.000000e+00 : f32
      %16 = vector.broadcast %cst_6 : f32 to vector<2x4xf32>
      %c0_7 = arith.constant 0 : index
      %c0_8 = arith.constant 0 : index
      %c0_9 = arith.constant 0 : index
      %17 = vector.load %arg5[%c0_7, %c0_8, %c0_9] : memref<1x2x4xf32, #tpu.memory_space<vmem>>, vector<1x2x4xf32>
      %18 = vector.shape_cast %17 : vector<1x2x4xf32> to vector<2x4xf32>
      %19 = vector.shape_cast %16 : vector<2x4xf32> to vector<1x2x4xf32>
      tpu.vector_store %arg5[%c0_7, %c0_8, %c0_9], %19 {strides = array<i32>} : memref<1x2x4xf32, #tpu.memory_space<vmem>>, vector<1x2x4xf32>,
      %cst_10 = arith.constant 0.000000e+00 : f32
      %20 = vector.broadcast %cst_10 : f32 to vector<2x4xf32>
      %c0_11 = arith.constant 0 : index
      %c0_12 = arith.constant 0 : index
      %c0_13 = arith.constant 0 : index
      %21 = vector.load %arg6[%c0_11, %c0_12, %c0_13] : memref<1x2x4xf32, #tpu.memory_space<vmem>>, vector<1x2x4xf32>
      %22 = vector.shape_cast %21 : vector<1x2x4xf32> to vector<2x4xf32>
      %23 = vector.shape_cast %20 : vector<2x4xf32> to vector<1x2x4xf32>
      tpu.vector_store %arg6[%c0_11, %c0_12, %c0_13], %23 {strides = array<i32>} : memref<1x2x4xf32, #tpu.memory_space<vmem>>, vector<1x2x4xf32>,
      %cst_14 = arith.constant 0.000000e+00 : f32
      %24 = vector.broadcast %cst_14 : f32 to vector<2x1xf32>
      %c0_15 = arith.constant 0 : index
      %c0_16 = arith.constant 0 : index
      %c0_17 = arith.constant 0 : index
      %25 = vector.load %arg7[%c0_15, %c0_16, %c0_17] : memref<1x2x1xf32, #tpu.memory_space<vmem>>, vector<1x2x1xf32>
      %26 = vector.shape_cast %25 : vector<1x2x1xf32> to vector<2x1xf32>
      %27 = vector.shape_cast %24 : vector<2x1xf32> to vector<1x2x1xf32>
      tpu.vector_store %arg7[%c0_15, %c0_16, %c0_17], %27 {strides = array<i32>} : memref<1x2x1xf32, #tpu.memory_space<vmem>>, vector<1x2x1xf32>,
    } else {
    }
    %c3_i32 = arith.constant 3 : i32
    %3 = arith.muli %arg0, %c3_i32 : i32
    %4 = arith.addi %3, %arg1 : i32
    %5 = tpu.iota {dimensions = array<i32: 1>} : vector<1x4x1xi32>
    %c2_i32 = arith.constant 2 : i32
    %6 = arith.cmpi slt, %4, %c2_i32 : i32
    %7 = arith.extui %6 : i1 to i32
    %c0_i32_1 = arith.constant 0 : i32
    %8 = arith.cmpi ne, %7, %c0_i32_1 : i32
    scf.if %8 {
      %c0 = arith.constant 0 : index
      %c0_4 = arith.constant 0 : index
      %c0_5 = arith.constant 0 : index
      %12 = vector.load %arg2[%c0, %c0_4, %c0_5] : memref<2x4x256xbf16, #tpu.memory_space<vmem>>, vector<2x4x256xbf16>
      %13 = arith.extf %12 : vector<2x4x256xbf16> to vector<2x4x256xf32>
      %c0_6 = arith.constant 0 : index
      %c0_7 = arith.constant 0 : index
      %c0_8 = arith.constant 0 : index
      %14 = vector.load %arg3[%c0_6, %c0_7, %c0_8] : memref<2x1x256xi32, #tpu.memory_space<vmem>>, vector<2x1x256xi32>
      %cst = arith.constant dense<0xFF800000> : vector<2x256xf32>
      %15 = vector.multi_reduction <maximumf>, %13, %cst [1] : vector<2x4x256xf32> to vector<2x256xf32>
      %16 = vector.shape_cast %15 : vector<2x256xf32> to vector<2x1x256xf32>
      %17 = vector.broadcast %16 : vector<2x1x256xf32> to vector<2x4x256xf32>
      %18 = arith.subf %13, %17 : vector<2x4x256xf32>
      %19 = math.exp %18 : vector<2x4x256xf32>
      %cst_9 = arith.constant dense<0.000000e+00> : vector<2x256xf32>
      %20 = vector.multi_reduction <add>, %19, %cst_9 [1] : vector<2x4x256xf32> to vector<2x256xf32>
      %21 = vector.shape_cast %20 : vector<2x256xf32> to vector<2x1x256xf32>
      %22 = tpu.reciprocal %21 {approx = true} : vector<2x1x256xf32> -> vector<2x1x256xf32>
      %23 = arith.mulf %21, %22 : vector<2x1x256xf32>
      %cst_10 = arith.constant 2.000000e+00 : f32
      %24 = vector.broadcast %cst_10 : f32 to vector<2x1x256xf32>
      %25 = arith.subf %24, %23 : vector<2x1x256xf32>
      %26 = arith.mulf %22, %25 : vector<2x1x256xf32>
      %27 = vector.broadcast %26 : vector<2x1x256xf32> to vector<2x4x256xf32>
      %28 = arith.mulf %19, %27 : vector<2x4x256xf32>
      %29 = math.log %21 : vector<2x1x256xf32>
      %30 = arith.addf %29, %16 : vector<2x1x256xf32>
      %31 = vector.broadcast %5 : vector<1x4x1xi32> to vector<2x4x256xi32>
      %32 = vector.broadcast %14 : vector<2x1x256xi32> to vector<2x4x256xi32>
      %33 = arith.cmpi eq, %31, %32 : vector<2x4x256xi32>
      %cst_11 = arith.constant 0.000000e+00 : f32
      %34 = vector.broadcast %cst_11 : f32 to vector<2x4x256xf32>
      %35 = arith.select %33, %28, %34 : vector<2x4x256xi1>, vector<2x4x256xf32>
      %cst_12 = arith.constant 0.000000e+00 : f32
      %36 = vector.broadcast %cst_12 : f32 to vector<2x4x256xf32>
      %37 = arith.select %33, %13, %36 : vector<2x4x256xi1>, vector<2x4x256xf32>
      %cst_13 = arith.constant dense<0.000000e+00> : vector<2x256xf32>
      %38 = vector.multi_reduction <add>, %37, %cst_13 [1] : vector<2x4x256xf32> to vector<2x256xf32>
      %39 = vector.shape_cast %38 : vector<2x256xf32> to vector<2x1x256xf32>
      %40 = arith.subf %30, %39 : vector<2x1x256xf32>
      %c0_14 = arith.constant 0 : index
      %c0_15 = arith.constant 0 : index
      %c0_16 = arith.constant 0 : index
      %41 = vector.load %arg4[%c0_14, %c0_15, %c0_16] : memref<1x2x4xf32, #tpu.memory_space<vmem>>, vector<1x2x4xf32>
      %42 = vector.shape_cast %41 : vector<1x2x4xf32> to vector<2x4xf32>
      %cst_17 = arith.constant dense<0.000000e+00> : vector<2x4xf32>
      %43 = vector.multi_reduction <add>, %35, %cst_17 [2] : vector<2x4x256xf32> to vector<2x4xf32>
      %44 = arith.addf %42, %43 : vector<2x4xf32>
      %c0_18 = arith.constant 0 : index
      %c0_19 = arith.constant 0 : index
      %c0_20 = arith.constant 0 : index
      %45 = vector.load %arg4[%c0_18, %c0_19, %c0_20] : memref<1x2x4xf32, #tpu.memory_space<vmem>>, vector<1x2x4xf32>
      %46 = vector.shape_cast %45 : vector<1x2x4xf32> to vector<2x4xf32>
      %47 = vector.shape_cast %44 : vector<2x4xf32> to vector<1x2x4xf32>
      tpu.vector_store %arg4[%c0_18, %c0_19, %c0_20], %47 {strides = array<i32>} : memref<1x2x4xf32, #tpu.memory_space<vmem>>, vector<1x2x4xf32>,
      %c0_21 = arith.constant 0 : index
      %c0_22 = arith.constant 0 : index
      %c0_23 = arith.constant 0 : index
      %48 = vector.load %arg5[%c0_21, %c0_22, %c0_23] : memref<1x2x4xf32, #tpu.memory_space<vmem>>, vector<1x2x4xf32>
      %49 = vector.shape_cast %48 : vector<1x2x4xf32> to vector<2x4xf32>
      %cst_24 = arith.constant dense<0.000000e+00> : vector<2x4xf32>
      %50 = vector.multi_reduction <add>, %28, %cst_24 [2] : vector<2x4x256xf32> to vector<2x4xf32>
      %51 = arith.addf %49, %50 : vector<2x4xf32>
      %c0_25 = arith.constant 0 : index
      %c0_26 = arith.constant 0 : index
      %c0_27 = arith.constant 0 : index
      %52 = vector.load %arg5[%c0_25, %c0_26, %c0_27] : memref<1x2x4xf32, #tpu.memory_space<vmem>>, vector<1x2x4xf32>
      %53 = vector.shape_cast %52 : vector<1x2x4xf32> to vector<2x4xf32>
      %54 = vector.shape_cast %51 : vector<2x4xf32> to vector<1x2x4xf32>
      tpu.vector_store %arg5[%c0_25, %c0_26, %c0_27], %54 {strides = array<i32>} : memref<1x2x4xf32, #tpu.memory_space<vmem>>, vector<1x2x4xf32>,
      %c0_28 = arith.constant 0 : index
      %c0_29 = arith.constant 0 : index
      %c0_30 = arith.constant 0 : index
      %55 = vector.load %arg6[%c0_28, %c0_29, %c0_30] : memref<1x2x4xf32, #tpu.memory_space<vmem>>, vector<1x2x4xf32>
      %56 = vector.shape_cast %55 : vector<1x2x4xf32> to vector<2x4xf32>
      %cst_31 = arith.constant 1.000000e+00 : f32
      %cst_32 = arith.constant 0.000000e+00 : f32
      %57 = vector.broadcast %cst_31 : f32 to vector<2x4x256xf32>
      %58 = vector.broadcast %cst_32 : f32 to vector<2x4x256xf32>
      %59 = arith.select %33, %57, %58 : vector<2x4x256xi1>, vector<2x4x256xf32>
      %cst_33 = arith.constant dense<0.000000e+00> : vector<2x4xf32>
      %60 = vector.multi_reduction <add>, %59, %cst_33 [2] : vector<2x4x256xf32> to vector<2x4xf32>
      %61 = arith.addf %56, %60 : vector<2x4xf32>
      %c0_34 = arith.constant 0 : index
      %c0_35 = arith.constant 0 : index
      %c0_36 = arith.constant 0 : index
      %62 = vector.load %arg6[%c0_34, %c0_35, %c0_36] : memref<1x2x4xf32, #tpu.memory_space<vmem>>, vector<1x2x4xf32>
      %63 = vector.shape_cast %62 : vector<1x2x4xf32> to vector<2x4xf32>
      %64 = vector.shape_cast %61 : vector<2x4xf32> to vector<1x2x4xf32>
      tpu.vector_store %arg6[%c0_34, %c0_35, %c0_36], %64 {strides = array<i32>} : memref<1x2x4xf32, #tpu.memory_space<vmem>>, vector<1x2x4xf32>,
      %c0_37 = arith.constant 0 : index
      %c0_38 = arith.constant 0 : index
      %c0_39 = arith.constant 0 : index
      %65 = vector.load %arg7[%c0_37, %c0_38, %c0_39] : memref<1x2x1xf32, #tpu.memory_space<vmem>>, vector<1x2x1xf32>
      %66 = vector.shape_cast %65 : vector<1x2x1xf32> to vector<2x1xf32>
      %cst_40 = arith.constant dense<0.000000e+00> : vector<2x1xf32>
      %67 = vector.multi_reduction <add>, %40, %cst_40 [2] : vector<2x1x256xf32> to vector<2x1xf32>
      %68 = arith.addf %66, %67 : vector<2x1xf32>
      %c0_41 = arith.constant 0 : index
      %c0_42 = arith.constant 0 : index
      %c0_43 = arith.constant 0 : index
      %69 = vector.load %arg7[%c0_41, %c0_42, %c0_43] : memref<1x2x1xf32, #tpu.memory_space<vmem>>, vector<1x2x1xf32>
      %70 = vector.shape_cast %69 : vector<1x2x1xf32> to vector<2x1xf32>
      %71 = vector.shape_cast %68 : vector<2x1xf32> to vector<1x2x1xf32>
      tpu.vector_store %arg7[%c0_41, %c0_42, %c0_43], %71 {strides = array<i32>} : memref<1x2x1xf32, #tpu.memory_space<vmem>>, vector<1x2x1xf32>,
    } else {
    }
    %c2_i32_2 = arith.constant 2 : i32
    %9 = arith.cmpi eq, %4, %c2_i32_2 : i32
    %10 = arith.extui %9 : i1 to i32
    %c0_i32_3 = arith.constant 0 : i32
    %11 = arith.cmpi ne, %10, %c0_i32_3 : i32
    scf.if %11 {
      %12 = tpu.iota {dimensions = array<i32: 2>} : vector<1x1x256xi32>
      %c128_i32 = arith.constant 128 : i32
      %13 = vector.broadcast %c128_i32 : i32 to vector<1x1x256xi32>
      %14 = arith.cmpi slt, %12, %13 : vector<1x1x256xi32>
      %c0 = arith.constant 0 : index
      %c0_4 = arith.constant 0 : index
      %c0_5 = arith.constant 0 : index
      %15 = vector.load %arg2[%c0, %c0_4, %c0_5] : memref<2x4x256xbf16, #tpu.memory_space<vmem>>, vector<2x4x256xbf16>
      %16 = arith.extf %15 : vector<2x4x256xbf16> to vector<2x4x256xf32>
      %c0_6 = arith.constant 0 : index
      %c0_7 = arith.constant 0 : index
      %c0_8 = arith.constant 0 : index
      %17 = vector.load %arg3[%c0_6, %c0_7, %c0_8] : memref<2x1x256xi32, #tpu.memory_space<vmem>>, vector<2x1x256xi32>
      %cst = arith.constant 0.000000e+00 : f32
      %18 = vector.shape_cast %14 : vector<1x1x256xi1> to vector<1x1x256xi1>
      %19 = vector.broadcast %18 : vector<1x1x256xi1> to vector<2x4x256xi1>
      %20 = vector.broadcast %cst : f32 to vector<2x4x256xf32>
      %21 = arith.select %19, %16, %20 : vector<2x4x256xi1>, vector<2x4x256xf32>
      %cst_9 = arith.constant dense<0xFF800000> : vector<2x256xf32>
      %22 = vector.multi_reduction <maximumf>, %21, %cst_9 [1] : vector<2x4x256xf32> to vector<2x256xf32>
      %23 = vector.shape_cast %22 : vector<2x256xf32> to vector<2x1x256xf32>
      %24 = vector.broadcast %23 : vector<2x1x256xf32> to vector<2x4x256xf32>
      %25 = arith.subf %21, %24 : vector<2x4x256xf32>
      %26 = math.exp %25 : vector<2x4x256xf32>
      %cst_10 = arith.constant dense<0.000000e+00> : vector<2x256xf32>
      %27 = vector.multi_reduction <add>, %26, %cst_10 [1] : vector<2x4x256xf32> to vector<2x256xf32>
      %28 = vector.shape_cast %27 : vector<2x256xf32> to vector<2x1x256xf32>
      %29 = tpu.reciprocal %28 {approx = true} : vector<2x1x256xf32> -> vector<2x1x256xf32>
      %30 = arith.mulf %28, %29 : vector<2x1x256xf32>
      %cst_11 = arith.constant 2.000000e+00 : f32
      %31 = vector.broadcast %cst_11 : f32 to vector<2x1x256xf32>
      %32 = arith.subf %31, %30 : vector<2x1x256xf32>
      %33 = arith.mulf %29, %32 : vector<2x1x256xf32>
      %34 = vector.broadcast %33 : vector<2x1x256xf32> to vector<2x4x256xf32>
      %35 = arith.mulf %26, %34 : vector<2x4x256xf32>
      %36 = math.log %28 : vector<2x1x256xf32>
      %37 = arith.addf %36, %23 : vector<2x1x256xf32>
      %38 = vector.broadcast %5 : vector<1x4x1xi32> to vector<2x4x256xi32>
      %39 = vector.broadcast %17 : vector<2x1x256xi32> to vector<2x4x256xi32>
      %40 = arith.cmpi eq, %38, %39 : vector<2x4x256xi32>
      %41 = vector.broadcast %14 : vector<1x1x256xi1> to vector<2x4x256xi1>
      %42 = arith.andi %40, %41 : vector<2x4x256xi1>
      %cst_12 = arith.constant 0.000000e+00 : f32
      %43 = vector.broadcast %cst_12 : f32 to vector<2x4x256xf32>
      %44 = arith.select %42, %35, %43 : vector<2x4x256xi1>, vector<2x4x256xf32>
      %cst_13 = arith.constant 0.000000e+00 : f32
      %45 = vector.broadcast %cst_13 : f32 to vector<2x4x256xf32>
      %46 = arith.select %42, %21, %45 : vector<2x4x256xi1>, vector<2x4x256xf32>
      %cst_14 = arith.constant dense<0.000000e+00> : vector<2x256xf32>
      %47 = vector.multi_reduction <add>, %46, %cst_14 [1] : vector<2x4x256xf32> to vector<2x256xf32>
      %48 = vector.shape_cast %47 : vector<2x256xf32> to vector<2x1x256xf32>
      %49 = arith.subf %37, %48 : vector<2x1x256xf32>
      %cst_15 = arith.constant 0.000000e+00 : f32
      %50 = vector.shape_cast %14 : vector<1x1x256xi1> to vector<1x1x256xi1>
      %51 = vector.broadcast %50 : vector<1x1x256xi1> to vector<2x4x256xi1>
      %52 = vector.broadcast %cst_15 : f32 to vector<2x4x256xf32>
      %53 = arith.select %51, %35, %52 : vector<2x4x256xi1>, vector<2x4x256xf32>
      %cst_16 = arith.constant 0.000000e+00 : f32
      %54 = vector.shape_cast %14 : vector<1x1x256xi1> to vector<1x1x256xi1>
      %55 = vector.broadcast %54 : vector<1x1x256xi1> to vector<2x1x256xi1>
      %56 = vector.broadcast %cst_16 : f32 to vector<2x1x256xf32>
      %57 = arith.select %55, %49, %56 : vector<2x1x256xi1>, vector<2x1x256xf32>
      %c0_17 = arith.constant 0 : index
      %c0_18 = arith.constant 0 : index
      %c0_19 = arith.constant 0 : index
      %58 = vector.load %arg4[%c0_17, %c0_18, %c0_19] : memref<1x2x4xf32, #tpu.memory_space<vmem>>, vector<1x2x4xf32>
      %59 = vector.shape_cast %58 : vector<1x2x4xf32> to vector<2x4xf32>
      %cst_20 = arith.constant dense<0.000000e+00> : vector<2x4xf32>
      %60 = vector.multi_reduction <add>, %44, %cst_20 [2] : vector<2x4x256xf32> to vector<2x4xf32>
      %61 = arith.addf %59, %60 : vector<2x4xf32>
      %c0_21 = arith.constant 0 : index
      %c0_22 = arith.constant 0 : index
      %c0_23 = arith.constant 0 : index
      %62 = vector.load %arg4[%c0_21, %c0_22, %c0_23] : memref<1x2x4xf32, #tpu.memory_space<vmem>>, vector<1x2x4xf32>
      %63 = vector.shape_cast %62 : vector<1x2x4xf32> to vector<2x4xf32>
      %64 = vector.shape_cast %61 : vector<2x4xf32> to vector<1x2x4xf32>
      tpu.vector_store %arg4[%c0_21, %c0_22, %c0_23], %64 {strides = array<i32>} : memref<1x2x4xf32, #tpu.memory_space<vmem>>, vector<1x2x4xf32>,
      %c0_24 = arith.constant 0 : index
      %c0_25 = arith.constant 0 : index
      %c0_26 = arith.constant 0 : index
      %65 = vector.load %arg5[%c0_24, %c0_25, %c0_26] : memref<1x2x4xf32, #tpu.memory_space<vmem>>, vector<1x2x4xf32>
      %66 = vector.shape_cast %65 : vector<1x2x4xf32> to vector<2x4xf32>
      %cst_27 = arith.constant dense<0.000000e+00> : vector<2x4xf32>
      %67 = vector.multi_reduction <add>, %53, %cst_27 [2] : vector<2x4x256xf32> to vector<2x4xf32>
      %68 = arith.addf %66, %67 : vector<2x4xf32>
      %c0_28 = arith.constant 0 : index
      %c0_29 = arith.constant 0 : index
      %c0_30 = arith.constant 0 : index
      %69 = vector.load %arg5[%c0_28, %c0_29, %c0_30] : memref<1x2x4xf32, #tpu.memory_space<vmem>>, vector<1x2x4xf32>
      %70 = vector.shape_cast %69 : vector<1x2x4xf32> to vector<2x4xf32>
      %71 = vector.shape_cast %68 : vector<2x4xf32> to vector<1x2x4xf32>
      tpu.vector_store %arg5[%c0_28, %c0_29, %c0_30], %71 {strides = array<i32>} : memref<1x2x4xf32, #tpu.memory_space<vmem>>, vector<1x2x4xf32>,
      %c0_31 = arith.constant 0 : index
      %c0_32 = arith.constant 0 : index
      %c0_33 = arith.constant 0 : index
      %72 = vector.load %arg6[%c0_31, %c0_32, %c0_33] : memref<1x2x4xf32, #tpu.memory_space<vmem>>, vector<1x2x4xf32>
      %73 = vector.shape_cast %72 : vector<1x2x4xf32> to vector<2x4xf32>
      %cst_34 = arith.constant 1.000000e+00 : f32
      %cst_35 = arith.constant 0.000000e+00 : f32
      %74 = vector.broadcast %cst_34 : f32 to vector<2x4x256xf32>
      %75 = vector.broadcast %cst_35 : f32 to vector<2x4x256xf32>
      %76 = arith.select %42, %74, %75 : vector<2x4x256xi1>, vector<2x4x256xf32>
      %cst_36 = arith.constant dense<0.000000e+00> : vector<2x4xf32>
      %77 = vector.multi_reduction <add>, %76, %cst_36 [2] : vector<2x4x256xf32> to vector<2x4xf32>
      %78 = arith.addf %73, %77 : vector<2x4xf32>
      %c0_37 = arith.constant 0 : index
      %c0_38 = arith.constant 0 : index
      %c0_39 = arith.constant 0 : index
      %79 = vector.load %arg6[%c0_37, %c0_38, %c0_39] : memref<1x2x4xf32, #tpu.memory_space<vmem>>, vector<1x2x4xf32>
      %80 = vector.shape_cast %79 : vector<1x2x4xf32> to vector<2x4xf32>
      %81 = vector.shape_cast %78 : vector<2x4xf32> to vector<1x2x4xf32>
      tpu.vector_store %arg6[%c0_37, %c0_38, %c0_39], %81 {strides = array<i32>} : memref<1x2x4xf32, #tpu.memory_space<vmem>>, vector<1x2x4xf32>,
      %c0_40 = arith.constant 0 : index
      %c0_41 = arith.constant 0 : index
      %c0_42 = arith.constant 0 : index
      %82 = vector.load %arg7[%c0_40, %c0_41, %c0_42] : memref<1x2x1xf32, #tpu.memory_space<vmem>>, vector<1x2x1xf32>
      %83 = vector.shape_cast %82 : vector<1x2x1xf32> to vector<2x1xf32>
      %cst_43 = arith.constant dense<0.000000e+00> : vector<2x1xf32>
      %84 = vector.multi_reduction <add>, %57, %cst_43 [2] : vector<2x1x256xf32> to vector<2x1xf32>
      %85 = arith.addf %83, %84 : vector<2x1xf32>
      %c0_44 = arith.constant 0 : index
      %c0_45 = arith.constant 0 : index
      %c0_46 = arith.constant 0 : index
      %86 = vector.load %arg7[%c0_44, %c0_45, %c0_46] : memref<1x2x1xf32, #tpu.memory_space<vmem>>, vector<1x2x1xf32>
      %87 = vector.shape_cast %86 : vector<1x2x1xf32> to vector<2x1xf32>
      %88 = vector.shape_cast %85 : vector<2x1xf32> to vector<1x2x1xf32>
      tpu.vector_store %arg7[%c0_44, %c0_45, %c0_46], %88 {strides = array<i32>} : memref<1x2x1xf32, #tpu.memory_space<vmem>>, vector<1x2x1xf32>,
    } else {
    }
    return
  }
  func.func @transform_0(%arg0: i32, %arg1: i32) -> (i32, i32, i32) {
    %c3_i32 = arith.constant 3 : i32
    %0 = arith.muli %arg0, %c3_i32 : i32
    %1 = arith.addi %0, %arg1 : i32
    %c0_i32 = arith.constant 0 : i32
    %c0_i32_0 = arith.constant 0 : i32
    %c0_i32_1 = arith.constant 0 : i32
    return %c0_i32, %c0_i32_0, %1 : i32, i32, i32
  }
  func.func @transform_1(%arg0: i32, %arg1: i32) -> (i32, i32, i32) {
    %c3_i32 = arith.constant 3 : i32
    %0 = arith.muli %arg0, %c3_i32 : i32
    %1 = arith.addi %0, %arg1 : i32
    %c0_i32 = arith.constant 0 : i32
    %c0_i32_0 = arith.constant 0 : i32
    %c0_i32_1 = arith.constant 0 : i32
    return %c0_i32, %c0_i32_0, %1 : i32, i32, i32
  }
  func.func @transform_2(%arg0: i32, %arg1: i32) -> (i32, i32, i32) {
    %c0_i32 = arith.constant 0 : i32
    %c0_i32_0 = arith.constant 0 : i32
    %c0_i32_1 = arith.constant 0 : i32
    return %arg0, %c0_i32, %c0_i32_0 : i32, i32, i32
  }
  func.func @transform_3(%arg0: i32, %arg1: i32) -> (i32, i32, i32) {
    %c0_i32 = arith.constant 0 : i32
    %c0_i32_0 = arith.constant 0 : i32
    %c0_i32_1 = arith.constant 0 : i32
    return %arg0, %c0_i32, %c0_i32_0 : i32, i32, i32
  }
  func.func @transform_4(%arg0: i32, %arg1: i32) -> (i32, i32, i32) {
    %c0_i32 = arith.constant 0 : i32
    %c0_i32_0 = arith.constant 0 : i32
    %c0_i32_1 = arith.constant 0 : i32
    return %arg0, %c0_i32, %c0_i32_0 : i32, i32, i32
  }
  func.func @transform_5(%arg0: i32, %arg1: i32) -> (i32, i32, i32) {
    %c0_i32 = arith.constant 0 : i32
    %c0_i32_0 = arith.constant 0 : i32
    %c0_i32_1 = arith.constant 0 : i32
    return %arg0, %c0_i32, %c0_i32_0 : i32, i32, i32
  }
}

</mosaic_0001>

<bundles_post_ra>
// kernel: tversky_and_ce_loss.1
= control target key start
LH: loop header
LB: loop body
LE: loop exit
PB: predicated region body
PF: predicated region fallthrough
CT: control target
= control target key end

     0   :  { %s2716_s18 = smov 0   ;;  %s2718_s19 = smov 0   ;;  %s3054_s0 = inlined_call_operand.vmem [shape: bf16[2,4,640], index: 0, kind: input, shape index: {}]   ;;  %s3055_s1 = inlined_call_operand.vmem [shape: s32[2,1,640], index: 1, kind: input, shape index: {}]   ;;  %s3056_s2 = inlined_call_operand.vmem [shape: f32[1,2,4], index: 2, kind: output, shape index: {0}]   ;;  %s3057_s3 = inlined_call_operand.vmem [shape: f32[1,2,4], index: 3, kind: output, shape index: {1}]   ;;  %s3058_s4 = inlined_call_operand.vmem [shape: f32[1,2,4], index: 4, kind: output, shape index: {2}]   ;;  %s3059_s5 = inlined_call_operand.vmem [shape: f32[1,2,1], index: 5, kind: output, shape index: {3}]  }
   0x1   :  { %s2720_s20 = smov 0   ;;  %s2722_s21 = smov 0  }
   0x2   :  { %s2724_s22 = smov 0  }
   0x3 LB: > { %s25_s23 = sadd.s32 1, %s2673_s21  ;;  %p46_p1 = scmp.ne.s32.totalorder %s2665_s19, %s2661_s18  ;;  %s2677_s22 = sphi %s2724_s22, %s16_s22   ;;  %s2673_s21 = sphi %s2722_s21, %s3064_s21   ;;  %s2669_s20 = sphi %s2720_s20, %s3063_s20   ;;  %s2665_s19 = sphi %s2718_s19, %s3062_s19   ;;  %s2661_s18 = sphi %s2716_s18, %s3061_s18  }
   0x4   : > { %p26_p0 = scmp.ge.s32.totalorder %s25_s23, 3  ;;  %p47_p2 = scmp.eq.s32.totalorder %s2677_s22, 0 }
   0x5   : > { %s39_s26 = sadd.s32 1, %s2665_s19  ;;  %p2090_p5 = scmp.ge.s32.totalorder %s2677_s22, 3 }
   0x6   : > { %s3066_s23 = smov (%p26_p0, %s25_s23), 0  ;;  %p2747_p3 = por %p47_p2, %p46_p1 }
   0x7   : > { %s36_s25 = ssub.s32 %s2673_s21, %s3066_s23  ;;  %206 = sbr.rel (%p2090_p5) target bundleno = 86 (0x56), region = 16 }
   0x8   : > { %p37_p4 = scmp.eq.s32.totalorder %s36_s25, 0 }
   0xa   : > { %s2755_s27 = scalar_select %p37_p4, %s2665_s19, %s39_s26  }
   0xc   : > { %209 = sbr.rel (!%p2747_p3) target bundleno = 49 (0x31), region = 20  ;;  %s211_s28 = sand.u32 (%p2747_p3), 1, %s2665_s19  }
   0xd   : > { %s2092_s29 = sshll.u32 (%p2747_p3), %s2673_s21, 1  ;;  %s2091_s30 = sshll.u32 (%p2747_p3), %s211_s28, 3 }
   0xe   : > { %s217_s6 = ssub.s32 (%p2747_p3), 5, %s2092_s29  ;;  %s2159_s7 = sshll.u32 (%p2747_p3), %s2673_s21, 2 }
   0xf   : > { %p218_p6 = scmp.lt.s32.totalorder (%p2747_p3), %s217_s6, 2  ;;  %s2766_s10 = scalar_lea.vmem (%p2747_p3), %s3054_s0, %s2159_s7  }
  0x10   : > { %s213_s13 = scalar_lea.vmem (%p2747_p3), [#allocation2], %s2091_s30  }
  0x11   : > { %s3068_s6 = smov (!%p218_p6, %s217_s6), 2 }
  0x12   : > { %s2093_s11 = sshll.u32 %s3068_s6, 6  ;;  %s2096_s12 = sshll.u32 %s3068_s6, 1 }
  0x13   : > { %p2097_p7 = scmp.eq.s32.totalorder %s2093_s11, 0 }
  0x14   : > { %p228_p8 = scmp.lt.u32.totalorder (!%p2097_p7), %s2096_s12, 8 }
  0x15   : > { %227 = sbr.rel (%p2097_p7) target bundleno = 49 (0x31), region = 24 }
  0x1a   : > { %231 = sbr.rel (%p228_p8) target bundleno = 39 (0x27), region = 28  ;;  %s249_s14 = sand.u32 (!%p228_p8), 7, %s2096_s12  }
  0x1b   : > { %p250_p9 = scmp.eq.s32.totalorder (!%p228_p8), %s249_s14, 0 }
  0x1f   : > { %435 = sbr.rel (%p250_p9) target bundleno = 39 (0x27), region = 61  ;;  %s437_s15 = ssub.s32 (!%p250_p9), %s2096_s12, %s249_s14 }
  0x20   : > { %s438_s16 = scalar_lea.vmem (!%p250_p9), %s2766_s10, %s437_s15  ;;  %s440_s17 = scalar_lea.vmem (!%p250_p9), %s213_s13, %s437_s15 [#allocation2] }
  0x21   : > { %s2679_s25 = smov (!%p250_p9), 1  }
  0x22   : > { %s620_s26 = sshll.u32 (!%p250_p9), %s2679_s25, %s249_s14 }
  0x23   : > { %s2117_s28 = sadd.s32 (!%p250_p9), 4294967295, %s620_s26 }
  0x24   : > { %v630_v0 = vld [vmem:[%s438_s16] sm:%s2117_s28]  ;;  %v632_v1 = vld [vmem:[%s438_s16 + $0xa] sm:%s2117_s28] }
  0x25   : > { %631 = vst [vmem:[%s440_s17] sm:%s2117_s28] %v630_v0 }
  0x26   : > { %633 = vst [vmem:[%s440_s17 + $0x4] sm:%s2117_s28] %v632_v1 }
  0x27 PF: > { %p2118_p10 = scmp.ge.u32.totalorder %s2096_s12, 8 }
  0x28   : > { %s2680_s29 = smov (!%p2118_p10), 1  }
  0x29   : > { %234 = sbr.rel (%p2118_p10) target bundleno = 49 (0x31), region = 32  ;;  %s235_s30 = sshll.u32 (!%p2118_p10), %s2680_s29, %s2096_s12 }
  0x2a   : > { %s2119_s6 = sadd.s32 (!%p2118_p10), 4294967295, %s235_s30 }
  0x2e   : > { %v245_v2 = vld [vmem:[%s2766_s10] sm:%s2119_s6]  ;;  %v247_v3 = vld [vmem:[%s2766_s10 + $0xa] sm:%s2119_s6] }
  0x2f   : > { %246 = vst [vmem:[%s213_s13] sm:%s2119_s6] %v245_v2 }
  0x30   : > { %248 = vst [vmem:[%s213_s13 + $0x4] sm:%s2119_s6] %v247_v3 }
  0x31 PF: > { %637 = sbr.rel (!%p2747_p3) target bundleno = 86 (0x56), region = 86  ;;  %s639_s7 = sand.u32 (%p2747_p3), 1, %s2665_s19  }
  0x32   : > { %s2121_s8 = sshll.u32 (%p2747_p3), %s2673_s21, 1  ;;  %s2120_s9 = sshll.u32 (%p2747_p3), %s639_s7, 2 }
  0x33   : > { %s645_s11 = ssub.s32 (%p2747_p3), 5, %s2121_s8  ;;  %s2778_s15 = scalar_lea.vmem (%p2747_p3), %s3055_s1, %s2121_s8  }
  0x34   : > { %p646_p11 = scmp.lt.s32.totalorder (%p2747_p3), %s645_s11, 2  ;;  %s641_s13 = scalar_lea.vmem (%p2747_p3), [#allocation3], %s2120_s9  }
  0x36   : > { %s3070_s11 = smov (!%p646_p11, %s645_s11), 2 }
  0x37   : > { %s2122_s10 = sshll.u32 %s3070_s11, 5 }
  0x38   : > { %p2124_p12 = scmp.eq.s32.totalorder %s2122_s10, 0 }
  0x39   : > { %p654_p13 = scmp.lt.u32.totalorder (!%p2124_p12), %s3070_s11, 8 }
  0x3a   : > { %653 = sbr.rel (%p2124_p12) target bundleno = 86 (0x56), region = 90 }
  0x3f   : > { %657 = sbr.rel (%p654_p13) target bundleno = 76 (0x4c), region = 94  ;;  %s675_s24 = sand.u32 (!%p654_p13), 7, %s3070_s11  }
  0x40   : > { %p676_p0 = scmp.eq.s32.totalorder (!%p654_p13), %s675_s24, 0 }
  0x44   : > { %861 = sbr.rel (%p676_p0) target bundleno = 76 (0x4c), region = 127  ;;  %s863_s16 = ssub.s32 (!%p676_p0), %s3070_s11, %s675_s24 }
  0x45   : > { %s864_s17 = scalar_lea.vmem (!%p676_p0), %s2778_s15, %s863_s16  ;;  %s866_s25 = scalar_lea.vmem (!%p676_p0), %s641_s13, %s863_s16 [#allocation3] }
  0x46   : > { %s2681_s26 = smov (!%p676_p0), 1  }
  0x47   : > { %s1046_s28 = sshll.u32 (!%p676_p0), %s2681_s26, %s675_s24 }
  0x48   : > { %s2144_s29 = sadd.s32 (!%p676_p0), 4294967295, %s1046_s28 }
  0x49   : > { %v1056_v4 = vld [vmem:[%s864_s17] sm:%s2144_s29] }
  0x4a   : > { %v1058_v5 = vld [vmem:[%s864_s17 + $0x5] sm:%s2144_s29]  ;;  %1057 = vst [vmem:[%s866_s25] sm:%s2144_s29] %v1056_v4 }
  0x4b   : > { %1059 = vst [vmem:[%s866_s25 + $0x2] sm:%s2144_s29] %v1058_v5 }
  0x4c PF: > { %p2145_p1 = scmp.ge.u32.totalorder %s3070_s11, 8 }
  0x4d   : > { %s2682_s30 = smov (!%p2145_p1), 1  }
  0x4e   : > { %660 = sbr.rel (%p2145_p1) target bundleno = 86 (0x56), region = 98  ;;  %s661_s6 = sshll.u32 (!%p2145_p1), %s2682_s30, %s3070_s11 }
  0x4f   : > { %s2146_s7 = sadd.s32 (!%p2145_p1), 4294967295, %s661_s6 }
  0x53   : > { %v671_v6 = vld [vmem:[%s2778_s15] sm:%s2146_s7] }
  0x54   : > { %v673_v7 = vld [vmem:[%s2778_s15 + $0x5] sm:%s2146_s7]  ;;  %672 = vst [vmem:[%s641_s13] sm:%s2146_s7] %v671_v6 }
  0x55   : > { %674 = vst [vmem:[%s641_s13 + $0x2] sm:%s2146_s7] %v673_v7 }
  0x56 PF: > { %p2147_p2 = scmp.ge.s32.totalorder %s2677_s22, 1  ;;  %p1062_p3 = scmp.lt.s32.totalorder %s2677_s22, 4 }
  0x58   : > { %p1063_p4 = pnand %p2147_p2, %p1062_p3 }
  0x59   : > { %s1069_s8 = sand.u32 (!%p1063_p4), 1, %s2661_s18   ;;  %p2150_p5 = scmp.ne.s32.totalorder (!%p1063_p4), %s2669_s20, 0 }
  0x5a   : > { %1066 = sbr.rel (%p1063_p4) target bundleno = 577 (0x241), region = 152  ;;  %s2786_s9 = sshll.u32 (!%p1063_p4), %s1069_s8, 3 }
  0x5b   : > { %s2149_s11 = sshll.u32 (!%p1063_p4), %s1069_s8, 2  ;;  %s1071_s14 = scalar_lea.vmem (!%p1063_p4), [#allocation2], %s2786_s9 }
  0x5c   : > { %s2789_s12 = scalar_lea.vmem (!%p1063_p4), [#allocation3], %s2149_s11 }
  0x5f   : > { %1151 = sbr.rel (%p2150_p5) target bundleno = 104 (0x68), region = 164 }
  0x64   : > { %vm1152_vm0 = vcmask 25600   ;;  %vm1156_vm1 = vcmask 1024   ;;  %v2683_v8 = vmov 0.0  }
  0x65   : > { %1153 = vst.msk [vmem:[%s3056_s2] sm:$0x3] %vm1152_vm0, %v2683_v8  ;;  %1154 = vst.msk [vmem:[%s3057_s3] sm:$0x3] %vm1152_vm0, %v2683_v8 }
  0x66   : > { %1155 = vst.msk [vmem:[%s3058_s4] sm:$0x3] %vm1152_vm0, %v2683_v8 }
  0x67   : > { %1157 = vst.msk [vmem:[%s3059_s5] sm:$0x3] %vm1156_vm1, %v2683_v8 }
  0x68 PF: > { %v1160_v9 = vlaneseq  ;;  %p2151_p6 = scmp.ge.s32.totalorder %s2669_s20, 2 }
  0x6a   : > { %v2805_v10 = vshrl.u32 %v1160_v9, 7  ;;  %1165 = sbr.rel (%p2151_p6) target bundleno = 348 (0x15c), region = 168 }
  0x6f   : > { %v1171_v11 = vld [vmem:[%s2789_s12 + $0x2] sm:$0x3]  ;;  %v1295_v12 = vsub.s32 0, %v2805_v10  ;;  %v1299_v13 = vsub.s32 1, %v2805_v10  ;;  %v2169_v14 = vld [vmem:[%s1071_s14] sm:$0xff]   ;;  %vm1178_vm2 = vcmask 1043456  }
  0x70   : > { %v1170_v15 = vld [vmem:[%s2789_s12] sm:$0x3]  ;;  %v2818_v18 = vunpack.c.h.bf16 %v2169_v14  ;;  %v2684_v22 = vmov 0.0   ;;  %v2170_v30 = vunpack.c.l.bf16 %v2169_v14  ;;  %vm1382_vm7 = vcmask 1041409  }
  0x71   : > { %v2814_v16 = vrot.slane %v1171_v11, %v1295_v12  ;;  %v2816_v17 = vrot.slane %v1171_v11, %v1299_v13  ;;  %v2820_v19 = vrot.slane %v1170_v15, %v1295_v12  ;;  %v2836_v26 = vrot.slane %v1170_v15, %v1299_v13 }
  0x72   : > { %v1175_v20 = vcombine.high %v2818_v18, %v2818_v18  ;;  %v1193_v21 = vsel %vm1178_vm2, %v2818_v18, -inf  ;;  %v1174_v39 = vcombine.high %v2170_v30, %v2170_v30  ;;  %v1179_v44 = vsel %vm1178_vm2, %v2170_v30, -inf }
  0x73   : > { %vm1311_vm3 = vcmp.eq.s32.totalorder %v2805_v10, %v2814_v16  ;;  %vm1312_vm4 = vcmp.eq.s32.totalorder %v2805_v10, %v2816_v17  ;;  %v1194_v25 = vrot.slane %v1193_v21, 4  ;;  %vm1309_vm5 = vcmp.eq.s32.totalorder %v2805_v10, %v2820_v19 }
  0x74   : > { %v1416_v23 = vsel %vm1311_vm3, 1.0, %v2684_v22  ;;  %v1417_v24 = vsel %vm1312_vm4, 1.0, %v2684_v22  ;;  %v1200_v29 = vsel %vm1178_vm2, %v1175_v20, -inf  ;;  %vm1310_vm6 = vcmp.eq.s32.totalorder %v2805_v10, %v2836_v26 }
  0x75   : > { %v1423_v27 = vsel %vm1178_vm2, %v1416_v23, 0.0  ;;  %v1424_v28 = vsel %vm1178_vm2, %v1417_v24, 0.0  ;;  %v1195_v32 = vmax.f32 %v1193_v21, %v1194_v25  ;;  %v1201_v33 = vrot.slane %v1200_v29, 4 }
  0x76   : > { %v1425_v31 = vadd.f32 %v1424_v28, %v1423_v27  ;;  %v1414_v36 = vsel %vm1309_vm5, 1.0, %v2684_v22  ;;  %v1415_v37 = vsel %vm1310_vm6, 1.0, %v2684_v22  ;;  %v1186_v45 = vsel %vm1178_vm2, %v1174_v39, -inf }
  0x77   : > { %v1196_v34 = vrot.slane %v1195_v32, 2  ;;  %v1202_v35 = vmax.f32 %v1200_v29, %v1201_v33  ;;  %v1418_v38 = vsel %vm1178_vm2, %v1414_v36, 0.0  ;;  %v1419_v42 = vsel %vm1178_vm2, %v1415_v37, 0.0 }
  0x78   : > { %1426 = vadd.xlane.f32.xlu1 %v1425_v31  ;;  %v1420_v43 = vadd.f32 %v1419_v42, %v1418_v38  ;;  %v1180_v48 = vrot.slane %v1179_v44, 4  ;;  %v1187_v49 = vrot.slane %v1186_v45, 4  ;;  %v1325_v11 = vsel %vm1311_vm3, %v2818_v18, 0.0 }
  0x79   : > { %v1197_v40 = vmax.f32 %v1195_v32, %v1196_v34  ;;  %v1203_v41 = vrot.slane %v1202_v35, 2  ;;  %v1326_v13 = vsel %vm1312_vm4, %v1175_v20, 0.0  ;;  %v1341_v22 = vsel %vm1178_vm2, %v1325_v11, 0.0 }
  0x7a   : > { %1421 = vadd.xlane.f32.xlu0 %v1420_v43  ;;  %v1181_v52 = vmax.f32 %v1179_v44, %v1180_v48  ;;  %v1188_v53 = vmax.f32 %v1186_v45, %v1187_v49  ;;  %v1348_v25 = vsel %vm1178_vm2, %v1326_v13, 0.0  ;;  %v1323_v20 = vsel %vm1309_vm5, %v2170_v30, 0.0 }
  0x7b   : > { %v1198_v46 = vrot.slane %v1197_v40, 1  ;;  %v1204_v47 = vmax.f32 %v1202_v35, %v1203_v41  ;;  %v1342_v32 = vrot.slane %v1341_v22, 4  ;;  %v1324_v33 = vsel %vm1310_vm6, %v1174_v39, 0.0 }
  0x7c   : > { %v1182_v55 = vrot.slane %v1181_v52, 2  ;;  %v1189_v56 = vrot.slane %v1188_v53, 2  ;;  %v1327_v41 = vsel %vm1178_vm2, %v1323_v20, 0.0  ;;  %v1373_v26 = vand.u32 127, %v1160_v9 }
  0x7d   : > { %v2855_v50 = vmax.f32 %v1197_v40, %v1198_v46  ;;  %v1205_v51 = vrot.slane %v1204_v47, 1  ;;  %v1349_v40 = vrot.slane %v1348_v25, 4  ;;  %v1343_v45 = vadd.f32 %v1342_v32, %v1341_v22 }
  0x7e   : > { %v1183_v58 = vmax.f32 %v1181_v52, %v1182_v55  ;;  %v1190_v59 = vmax.f32 %v1188_v53, %v1189_v56  ;;  %v1334_v46 = vsel %vm1178_vm2, %v1324_v33, 0.0  ;;  %vm1386_vm8 = vcmask 25600  }
  0x7f   : > { %v2857_v54 = vmax.f32 %v1204_v47, %v1205_v51  ;;  %v1350_v39 = vadd.f32 %v1349_v40, %v1348_v25  ;;  %v1328_v51 = vrot.slane %v1327_v41, 4  ;;  %v1335_v55 = vrot.slane %v1334_v46, 4 }
  0x80   : > { %v1184_v61 = vrot.slane %v1183_v58, 1  ;;  %v1191_v62 = vrot.slane %v1190_v59, 1  ;;  %v1344_v56 = vrot.slane %v1343_v45, 2  ;;  %vm1454_vm9 = vcmask 1024  }
  0x81   : > { %v1212_v57 = vcombine.low %v2855_v50, %v2857_v54 }
  0x82   : > { %v2862_v0 = vmax.f32 %v1183_v58, %v1184_v61  ;;  %v2864_v1 = vmax.f32 %v1190_v59, %v1191_v62  ;;  %v1329_v59 = vadd.f32 %v1328_v51, %v1327_v41  ;;  %v1336_v62 = vadd.f32 %v1335_v55, %v1334_v46 }
  0x83   : > { %v1216_v60 = vsub.f32 %v2818_v18, %v1212_v57 }
  0x84   : > { %v1211_v2 = vcombine.low %v2862_v0, %v2864_v1 }
  0x85   : > { %v1219_v63 = vmul.f32 1.442695, %v1216_v60  ;;  %v1351_v60 = vrot.slane %v1350_v39, 2 }
  0x86   : > { %v1215_v3 = vsub.f32 %v2170_v30, %v1211_v2 }
  0x87   : > { %2479 = vpow2.f32 %v1219_v63  ;;  %v1345_v63 = vadd.f32 %v1344_v56, %v1343_v45  ;;  %v1352_v2 = vadd.f32 %v1351_v60, %v1350_v39 }
  0x88   : > { %v1217_v4 = vmul.f32 1.442695, %v1215_v3  ;;  %v1330_v3 = vrot.slane %v1329_v59, 2 }
  0x8a   : > { %2481 = vpow2.f32 %v1217_v4  ;;  %v1346_v4 = vrot.slane %v1345_v63, 1  ;;  %v1331_v11 = vadd.f32 %v1330_v3, %v1329_v59 }
  0x8c   : > { %v1347_v22 = vadd.f32 %v1346_v4, %v1345_v63 }
  0x94   : > { %v2868_v5 = vpop.eup %2479 }
  0x95   : > { %v1224_v6 = vcombine.high %v2868_v5, %v2868_v5  ;;  %v1241_v7 = vsel %vm1178_vm2, %v2868_v5, 0.0 }
  0x96   : > { %v1242_v8 = vrot.slane %v1241_v7, 4 }
  0x97   : > { %v1248_v12 = vsel %vm1178_vm2, %v1224_v6, 0.0  ;;  %v2882_v21 = vpop.eup %2481  ;;  %v1337_v6 = vrot.slane %v1336_v62, 2 }
  0x98   : > { %v1243_v14 = vadd.f32 %v1242_v8, %v1241_v7  ;;  %v1249_v15 = vrot.slane %v1248_v12, 4  ;;  %v1223_v27 = vcombine.high %v2882_v21, %v2882_v21  ;;  %v1227_v18 = vsel %vm1178_vm2, %v2882_v21, 0.0 }
  0x99   : > { %v1228_v28 = vrot.slane %v1227_v18, 4  ;;  %v1353_v8 = vrot.slane %v1352_v2, 1 }
  0x9a   : > { %v1244_v23 = vrot.slane %v1243_v14, 2  ;;  %v1250_v24 = vadd.f32 %v1249_v15, %v1248_v12  ;;  %v1234_v34 = vsel %vm1178_vm2, %v1223_v27, 0.0 }
  0x9b   : > { %v1229_v35 = vadd.f32 %v1228_v28, %v1227_v18  ;;  %v1235_v36 = vrot.slane %v1234_v34, 4  ;;  %v1354_v28 = vadd.f32 %v1353_v8, %v1352_v2 }
  0x9c   : > { %v1245_v29 = vadd.f32 %v1244_v23, %v1243_v14  ;;  %v1251_v31 = vrot.slane %v1250_v24, 2  ;;  %v1338_v23 = vadd.f32 %v1337_v6, %v1336_v62 }
  0x9d   : > { %v1230_v42 = vrot.slane %v1229_v35, 2  ;;  %v1236_v43 = vadd.f32 %v1235_v36, %v1234_v34 }
  0x9e   : > { %v1246_v37 = vrot.slane %v1245_v29, 1  ;;  %v1252_v38 = vadd.f32 %v1251_v31, %v1250_v24  ;;  %v1339_v36 = vrot.slane %v1338_v23, 1 }
  0x9f   : > { %v1231_v47 = vadd.f32 %v1230_v42, %v1229_v35  ;;  %v1237_v48 = vrot.slane %v1236_v43, 2 }
  0xa0   : > { %v1247_v30 = vadd.f32 %v1246_v37, %v1245_v29  ;;  %v1253_v44 = vrot.slane %v1252_v38, 1  ;;  %v1332_v29 = vrot.slane %v1331_v11, 1  ;;  %v1340_v39 = vadd.f32 %v1339_v36, %v1338_v23  ;;  %v1413_v23 = vld [vmem:[%s3058_s4] sm:$0x3] }
  0xa1   : > { %v1232_v52 = vrot.slane %v1231_v47, 1  ;;  %v1238_v53 = vadd.f32 %v1237_v48, %v1236_v43 }
  0xa2   : > { %v1254_v49 = vadd.f32 %v1253_v44, %v1252_v38  ;;  %2483 = vrcp.f32 %v1247_v30 }
  0xa3   : > { %2485 = vlog2.f32 %v1247_v30  ;;  %v1233_v57 = vadd.f32 %v1232_v52, %v1231_v47  ;;  %v1239_v58 = vrot.slane %v1238_v53, 1 }
  0xa4   : > { %2487 = vrcp.f32 %v1254_v49 }
  0xa5   : > { %2489 = vlog2.f32 %v1254_v49  ;;  %v1240_v61 = vadd.f32 %v1239_v58, %v1238_v53 }
  0xa6   : > { %2491 = vrcp.f32 %v1233_v57 }
  0xa7   : > { %2493 = vlog2.f32 %v1233_v57 }
  0xa8   : > { %2495 = vrcp.f32 %v1240_v61 }
  0xa9   : > { %2497 = vlog2.f32 %v1240_v61 }
  0xaf   : > { %v2484_v7 = vpop.eup %2483 }
  0xb0   : > { %v2486_v12 = vpop.eup %2485  ;;  %v1261_v13 = vmul.f32 %v2484_v7, %v1247_v30  ;;  %v1333_v30 = vadd.f32 %v1332_v29, %v1331_v11 }
  0xb1   : > { %v2488_v14 = vpop.eup %2487  ;;  %v1286_v15 = vmul.f32 0.6931472, %v2486_v12 }
  0xb2   : > { %v2490_v24 = vpop.eup %2489  ;;  %v1262_v25 = vmul.f32 %v2488_v14, %v1254_v49  ;;  %v1265_v27 = vsub.f32 2.0, %v1261_v13  ;;  %v1376_v13 = vsub.s32 %v1373_v26, %v2805_v10 }
  0xb3   : > { %v1288_v18 = vmul.f32 0.6931472, %v2490_v24  ;;  %v1291_v20 = vadd.f32 %v1286_v15, %v2855_v50  ;;  %v2492_v33 = vpop.eup %2491 }
  0xb4   : > { %v1266_v31 = vsub.f32 2.0, %v1262_v25  ;;  %v1269_v32 = vmul.f32 %v2484_v7, %v1265_v27  ;;  %v2494_v37 = vpop.eup %2493  ;;  %v1259_v38 = vmul.f32 %v2492_v33, %v1233_v57 }
  0xb5   : > { %v1292_v34 = vadd.f32 %v1288_v18, %v2857_v54  ;;  %v1357_v35 = vsub.f32 %v1291_v20, %v1347_v22  ;;  %v2496_v41 = vpop.eup %2495  ;;  %v1282_v43 = vmul.f32 0.6931472, %v2494_v37 }
  0xb6   : > { %v1270_v40 = vmul.f32 %v2488_v14, %v1266_v31  ;;  %v2498_v44 = vpop.eup %2497  ;;  %v1260_v45 = vmul.f32 %v2496_v41, %v1240_v61  ;;  %v1263_v46 = vsub.f32 2.0, %v1259_v38  ;;  %v1388_v31 = vld [vmem:[%s3057_s3] sm:$0x3] }
  0xb7   : > { %v1358_v42 = vsub.f32 %v1292_v34, %v1354_v28  ;;  %v1284_v48 = vmul.f32 0.6931472, %v2498_v44  ;;  %v1289_v49 = vadd.f32 %v1282_v43, %v2862_v0 }
  0xb8   : > { %v1276_v50 = vcombine.low %v1269_v32, %v1270_v40  ;;  %v1264_v51 = vsub.f32 2.0, %v1260_v45  ;;  %v1267_v54 = vmul.f32 %v2492_v33, %v1263_v46 }
  0xb9   : > { %v1446_v47 = vadd.f32 %v1358_v42, %v1357_v35  ;;  %v1290_v53 = vadd.f32 %v1284_v48, %v2864_v1  ;;  %v1355_v55 = vsub.f32 %v1289_v49, %v1333_v30  ;;  %v1359_v35 = vld [vmem:[%s3056_s2] sm:$0x3] }
  0xba   : > { %v1280_v52 = vmul.f32 %v2868_v5, %v1276_v50  ;;  %v1268_v56 = vmul.f32 %v2496_v41, %v1264_v51  ;;  %v1442_v42 = vld [vmem:[%s3059_s5] sm:$0x3] }
  0xbb   : > { %v1356_v57 = vsub.f32 %v1290_v53, %v1340_v39 }
  0xbc   : > { %v1275_v58 = vcombine.low %v1267_v54, %v1268_v56  ;;  %v1316_v59 = vcombine.high %v1280_v52, %v1280_v52  ;;  %v1321_v62 = vsel %vm1311_vm3, %v1280_v52, 0.0 }
  0xbd   : > { %v1443_v60 = vadd.f32 %v1356_v57, %v1355_v55  ;;  %v1365_v7 = vsel %vm1178_vm2, %v1321_v62, 0.0 }
  0xbe   : > { %v1279_v61 = vmul.f32 %v2882_v21, %v1275_v58  ;;  %v1322_v1 = vsel %vm1312_vm4, %v1316_v59, 0.0  ;;  %v1394_v21 = vsel %vm1178_vm2, %v1280_v52, 0.0  ;;  %v1395_v4 = vsel %vm1178_vm2, %v1316_v59, 0.0 }
  0xbf   : > { %v1366_v17 = vsel %vm1178_vm2, %v1322_v1, 0.0  ;;  %v1396_v11 = vadd.f32 %v1395_v4, %v1394_v21 }
  0xc0   : > { %v1315_v0 = vcombine.high %v1279_v61, %v1279_v61  ;;  %v1389_v63 = vsel %vm1178_vm2, %v1279_v61, 0.0  ;;  %v1319_v5 = vsel %vm1309_vm5, %v1279_v61, 0.0  ;;  %v1367_v12 = vadd.f32 %v1366_v17, %v1365_v7 }
  0xc1   : > { %v1360_v2 = vsel %vm1178_vm2, %v1319_v5, 0.0 }
  0xc2   : > { %v1390_v3 = vsel %vm1178_vm2, %v1315_v0, 0.0  ;;  %v1320_v16 = vsel %vm1310_vm6, %v1315_v0, 0.0 }
  0xc3   : > { %v1391_v6 = vadd.f32 %v1390_v3, %v1389_v63  ;;  %v1361_v19 = vsel %vm1178_vm2, %v1320_v16, 0.0 }
  0xc4   : > { %v1362_v8 = vadd.f32 %v1361_v19, %v1360_v2 }
  0xc5   : > { %1392 = vadd.xlane.f32.xlu1 %v1391_v6 }
  0xc6   : > { %1363 = vadd.xlane.f32.xlu0 %v1362_v8 }
  0xc9   : > { %1397 = vadd.xlane.f32.xlu1 %v1396_v11 }
  0xca   : > { %1368 = vadd.xlane.f32.xlu0 %v1367_v12 }
  0xcd   : > { %1447 = vadd.xlane.f32.xlu1 %v1446_v47 }
  0xce   : > { %1444 = vadd.xlane.f32.xlu0 %v1443_v60 }
 0x101   : > { %v1427_v14 = vpop.xlane.xlu1 %1426 }
 0x102   : > { %v1437_v15 = vrot.slane %v1427_v14, %v1376_v13 }
 0x103   : > { %v1422_v22 = vpop.xlane.xlu0 %1421 }
 0x104   : > { %v1433_v24 = vrot.slane %v1422_v22, %v1376_v13 }
 0x106   : > { %v1438_v25 = vsel %vm1382_vm7, %v1437_v15, %v1433_v24 }
 0x107   : > { %v1440_v27 = vadd.f32 %v1438_v25, %v1413_v23 }
 0x109   : > { %1441 = vst.msk [vmem:[%s3058_s4] sm:$0x3] %vm1386_vm8, %v1440_v27 }
 0x14e   : > { %v1393_v18 = vpop.xlane.xlu1 %1392 }
 0x14f   : > { %v1364_v20 = vpop.xlane.xlu0 %1363  ;;  %v1404_v29 = vrot.slane %v1393_v18, %v1376_v13 }
 0x150   : > { %v1377_v34 = vrot.slane %v1364_v20, %v1376_v13 }
 0x152   : > { %v1398_v28 = vpop.xlane.xlu1 %1397 }
 0x153   : > { %v1408_v32 = vrot.slane %v1398_v28, %v1376_v13  ;;  %v1369_v33 = vpop.xlane.xlu0 %1368 }
 0x154   : > { %v1381_v36 = vrot.slane %v1369_v33, %v1376_v13 }
 0x155   : > { %v1409_v37 = vsel %vm1382_vm7, %v1408_v32, %v1404_v29 }
 0x156   : > { %v1411_v38 = vadd.f32 %v1409_v37, %v1388_v31  ;;  %v1383_v40 = vsel %vm1382_vm7, %v1381_v36, %v1377_v34  ;;  %v1448_v41 = vpop.xlane.xlu1 %1447 }
 0x157   : > { %v1385_v43 = vadd.f32 %v1383_v40, %v1359_v35  ;;  %v1445_v30 = vpop.xlane.xlu0 %1444 }
 0x158   : > { %1412 = vst.msk [vmem:[%s3057_s3] sm:$0x3] %vm1386_vm8, %v1411_v38  ;;  %v1451_v44 = vsel %vm1382_vm7, %v1448_v41, %v1445_v30 }
 0x159   : > { %1387 = vst.msk [vmem:[%s3056_s2] sm:$0x3] %vm1386_vm8, %v1385_v43  ;;  %v1453_v45 = vadd.f32 %v1451_v44, %v1442_v42 }
 0x15b   : > { %1455 = vst.msk [vmem:[%s3059_s5] sm:$0x3] %vm1454_vm9, %v1453_v45 }
 0x15c PF: > { %p2152_p7 = scmp.ne.s32.totalorder %s2669_s20, 2 }
 0x15e   : > { %1459 = sbr.rel (%p2152_p7) target bundleno = 577 (0x241), region = 172 }
 0x163   : > { %v1470_v46 = vld [vmem:[%s2789_s12 + $0x2] sm:$0x3]  ;;  %vm1485_vm10 = vcmask 1043456   ;;  %v1588_v50 = vsub.s32 0, %v2805_v10  ;;  %v2173_v47 = vld [vmem:[%s1071_s14] sm:$0xff]   ;;  %v2685_v57 = vmov 0.0  }
 0x164   : > { %v2175_v48 = vunpack.c.h.bf16 %v2173_v47  ;;  %v1469_v49 = vld [vmem:[%s2789_s12] sm:$0x3]  ;;  %v2174_v39 = vunpack.c.l.bf16 %v2173_v47  ;;  %vm1679_vm13 = vcmask 1041409   ;;  %vm1683_vm14 = vcmask 25600  }
 0x165   : > { %v2964_v51 = vrot.slane %v1470_v46, %v1588_v50  ;;  %v2966_v54 = vrot.slane %v1469_v49, %v1588_v50  ;;  %vm1751_vm15 = vcmask 1024  }
 0x166   : > { %v1500_v52 = vsel %vm1485_vm10, %v2175_v48, -inf  ;;  %v1486_v53 = vsel %vm1485_vm10, %v2174_v39, -inf }
 0x167   : > { %vm1604_vm11 = vcmp.eq.s32.totalorder %v2805_v10, %v2964_v51  ;;  %v1501_v55 = vrot.slane %v1500_v52, 4  ;;  %vm1602_vm12 = vcmp.eq.s32.totalorder %v2805_v10, %v2966_v54  ;;  %v1487_v56 = vrot.slane %v1486_v53, 4 }
 0x168   : > { %v1713_v58 = vsel %vm1604_vm11, 1.0, %v2685_v57  ;;  %v1711_v59 = vsel %vm1602_vm12, 1.0, %v2685_v57  ;;  %v1616_v28 = vsel %vm1604_vm11, %v2175_v48, 0.0  ;;  %v1614_v31 = vsel %vm1602_vm12, %v2174_v39, 0.0 }
 0x169   : > { %v1720_v60 = vsel %vm1485_vm10, %v1713_v58, 0.0  ;;  %v1502_v61 = vmax.f32 %v1500_v52, %v1501_v55  ;;  %v1715_v62 = vsel %vm1485_vm10, %v1711_v59, 0.0  ;;  %v1488_v0 = vmax.f32 %v1486_v53, %v1487_v56 }
 0x16a   : > { %1723 = vadd.xlane.f32.xlu1 %v1720_v60  ;;  %1718 = vadd.xlane.f32.xlu0 %v1715_v62  ;;  %v1632_v33 = vsel %vm1485_vm10, %v1616_v28, 0.0  ;;  %v1618_v34 = vsel %vm1485_vm10, %v1614_v31, 0.0  ;;  %v1461_v51 = vand.u32 127, %v1160_v9 }
 0x16b   : > { %v1503_v63 = vrot.slane %v1502_v61, 2  ;;  %v1489_v5 = vrot.slane %v1488_v0, 2  ;;  %v1633_v35 = vrot.slane %v1632_v33, 4  ;;  %v1619_v36 = vrot.slane %v1618_v34, 4 }
 0x16d   : > { %v1504_v1 = vmax.f32 %v1502_v61, %v1503_v63  ;;  %v1490_v2 = vmax.f32 %v1488_v0, %v1489_v5  ;;  %v1634_v37 = vadd.f32 %v1633_v35, %v1632_v33  ;;  %v1620_v38 = vadd.f32 %v1619_v36, %v1618_v34 }
 0x16f   : > { %v1505_v3 = vrot.slane %v1504_v1, 1  ;;  %v1491_v16 = vrot.slane %v1490_v2, 1  ;;  %v1635_v40 = vrot.slane %v1634_v37, 2  ;;  %v1621_v42 = vrot.slane %v1620_v38, 2 }
 0x171   : > { %v1506_v21 = vmax.f32 %v1504_v1, %v1505_v3  ;;  %v2982_v4 = vmax.f32 %v1490_v2, %v1491_v16  ;;  %v1636_v46 = vadd.f32 %v1635_v40, %v1634_v37 }
 0x173   : > { %v1516_v6 = vsub.f32 %v2175_v48, %v1506_v21  ;;  %v1514_v19 = vsub.f32 %v2174_v39, %v2982_v4  ;;  %v1622_v48 = vadd.f32 %v1621_v42, %v1620_v38  ;;  %v1637_v56 = vrot.slane %v1636_v46, 1 }
 0x175   : > { %v1522_v7 = vmul.f32 1.442695, %v1516_v6  ;;  %v1518_v17 = vmul.f32 1.442695, %v1514_v19  ;;  %v1623_v59 = vrot.slane %v1622_v48, 1  ;;  %v1638_v5 = vadd.f32 %v1637_v56, %v1636_v46 }
 0x176   : > { %v1673_v19 = vsub.s32 %v1461_v51, %v2805_v10 }
 0x177   : > { %2499 = vpow2.f32 %v1522_v7  ;;  %v1624_v3 = vadd.f32 %v1623_v59, %v1622_v48 }
 0x178   : > { %2501 = vpow2.f32 %v1518_v17 }
 0x184   : > { %v2500_v8 = vpop.eup %2499 }
 0x185   : > { %v2502_v11 = vpop.eup %2501  ;;  %v1540_v12 = vsel %vm1485_vm10, %v2500_v8, 0.0 }
 0x186   : > { %v1526_v26 = vsel %vm1485_vm10, %v2502_v11, 0.0  ;;  %v1541_v13 = vrot.slane %v1540_v12, 4 }
 0x187   : > { %v1527_v14 = vrot.slane %v1526_v26, 4 }
 0x188   : > { %v1542_v15 = vadd.f32 %v1541_v13, %v1540_v12 }
 0x189   : > { %v1528_v22 = vadd.f32 %v1527_v14, %v1526_v26  ;;  %v1685_v14 = vld [vmem:[%s3057_s3] sm:$0x3] }
 0x18a   : > { %v1543_v23 = vrot.slane %v1542_v15, 2 }
 0x18b   : > { %v1529_v24 = vrot.slane %v1528_v22, 2 }
 0x18c   : > { %v1544_v25 = vadd.f32 %v1543_v23, %v1542_v15 }
 0x18d   : > { %v1530_v27 = vadd.f32 %v1529_v24, %v1528_v22  ;;  %v1658_v24 = vld [vmem:[%s3056_s2] sm:$0x3] }
 0x18e   : > { %v1545_v18 = vrot.slane %v1544_v25, 1 }
 0x18f   : > { %v1531_v20 = vrot.slane %v1530_v27, 1 }
 0x190   : > { %v1546_v29 = vadd.f32 %v1545_v18, %v1544_v25 }
 0x191   : > { %v1532_v32 = vadd.f32 %v1531_v20, %v1530_v27 }
 0x192   : > { %2503 = vrcp.f32 %v1546_v29 }
 0x193   : > { %2505 = vrcp.f32 %v1532_v32 }
 0x194   : > { %2507 = vlog2.f32 %v1546_v29 }
 0x195   : > { %2509 = vlog2.f32 %v1532_v32 }
 0x19f   : > { %v2504_v41 = vpop.eup %2503 }
 0x1a0   : > { %v2506_v43 = vpop.eup %2505  ;;  %v1560_v30 = vmul.f32 %v2504_v41, %v1546_v29  ;;  %v1739_v29 = vld [vmem:[%s3059_s5] sm:$0x3] }
 0x1a1   : > { %v1558_v44 = vmul.f32 %v2506_v43, %v1532_v32  ;;  %v2508_v50 = vpop.eup %2507 }
 0x1a2   : > { %v1564_v45 = vsub.f32 2.0, %v1560_v30  ;;  %v2510_v49 = vpop.eup %2509  ;;  %v1579_v55 = vmul.f32 0.6931472, %v2508_v50 }
 0x1a3   : > { %v1562_v47 = vsub.f32 2.0, %v1558_v44  ;;  %v1575_v58 = vmul.f32 0.6931472, %v2510_v49 }
 0x1a4   : > { %v1568_v39 = vmul.f32 %v2504_v41, %v1564_v45  ;;  %v1584_v63 = vadd.f32 %v1579_v55, %v1506_v21 }
 0x1a5   : > { %v1566_v52 = vmul.f32 %v2506_v43, %v1562_v47  ;;  %v1582_v2 = vadd.f32 %v1575_v58, %v2982_v4  ;;  %v1710_v4 = vld [vmem:[%s3058_s4] sm:$0x3] }
 0x1a6   : > { %v1572_v53 = vmul.f32 %v2500_v8, %v1568_v39  ;;  %v1648_v54 = vsub.f32 %v1584_v63, %v1638_v5 }
 0x1a7   : > { %v1570_v57 = vmul.f32 %v2502_v11, %v1566_v52  ;;  %v1646_v6 = vsub.f32 %v1582_v2, %v1624_v3 }
 0x1a8   : > { %v1612_v62 = vsel %vm1604_vm11, %v1572_v53, 0.0  ;;  %v1691_v1 = vsel %vm1485_vm10, %v1572_v53, 0.0 }
 0x1a9   : > { %v1686_v60 = vsel %vm1485_vm10, %v1570_v57, 0.0  ;;  %v1610_v61 = vsel %vm1602_vm12, %v1570_v57, 0.0  ;;  %v1664_v16 = vsel %vm1485_vm10, %v1612_v62, 0.0 }
 0x1aa   : > { %1689 = vadd.xlane.f32.xlu1 %v1686_v60  ;;  %v1659_v0 = vsel %vm1485_vm10, %v1610_v61, 0.0 }
 0x1ab   : > { %1662 = vadd.xlane.f32.xlu0 %v1659_v0 }
 0x1ae   : > { %1694 = vadd.xlane.f32.xlu1 %v1691_v1 }
 0x1af   : > { %1667 = vadd.xlane.f32.xlu0 %v1664_v16 }
 0x1b2   : > { %1744 = vadd.xlane.f32.xlu1 %v1648_v54 }
 0x1b3   : > { %1741 = vadd.xlane.f32.xlu0 %v1646_v6 }
 0x1f3   : > { %v1724_v21 = vpop.xlane.xlu1 %1723  ;;  %v1719_v7 = vpop.xlane.xlu0 %1718 }
 0x1f4   : > { %v1734_v17 = vrot.slane %v1724_v21, %v1673_v19  ;;  %v1730_v8 = vrot.slane %v1719_v7, %v1673_v19 }
 0x1f6   : > { %v1735_v11 = vsel %vm1679_vm13, %v1734_v17, %v1730_v8 }
 0x1f7   : > { %v1737_v12 = vadd.f32 %v1735_v11, %v1710_v4 }
 0x1f9   : > { %1738 = vst.msk [vmem:[%s3058_s4] sm:$0x3] %vm1683_vm14, %v1737_v12 }
 0x233   : > { %v1690_v9 = vpop.xlane.xlu1 %1689 }
 0x234   : > { %v1663_v10 = vpop.xlane.xlu0 %1662  ;;  %v1701_v13 = vrot.slane %v1690_v9, %v1673_v19 }
 0x235   : > { %v1674_v23 = vrot.slane %v1663_v10, %v1673_v19 }
 0x237   : > { %v1695_v26 = vpop.xlane.xlu1 %1694 }
 0x238   : > { %v1705_v15 = vrot.slane %v1695_v26, %v1673_v19  ;;  %v1668_v22 = vpop.xlane.xlu0 %1667 }
 0x239   : > { %v1678_v25 = vrot.slane %v1668_v22, %v1673_v19 }
 0x23a   : > { %v1706_v27 = vsel %vm1679_vm13, %v1705_v15, %v1701_v13 }
 0x23b   : > { %v1708_v18 = vadd.f32 %v1706_v27, %v1685_v14  ;;  %v1680_v20 = vsel %vm1679_vm13, %v1678_v25, %v1674_v23  ;;  %v1745_v28 = vpop.xlane.xlu1 %1744 }
 0x23c   : > { %v1682_v31 = vadd.f32 %v1680_v20, %v1658_v24  ;;  %v1742_v32 = vpop.xlane.xlu0 %1741 }
 0x23d   : > { %1709 = vst.msk [vmem:[%s3057_s3] sm:$0x3] %vm1683_vm14, %v1708_v18  ;;  %v1748_v33 = vsel %vm1679_vm13, %v1745_v28, %v1742_v32 }
 0x23e   : > { %1684 = vst.msk [vmem:[%s3056_s2] sm:$0x3] %vm1683_vm14, %v1682_v31  ;;  %v1750_v34 = vadd.f32 %v1748_v33, %v1739_v29 }
 0x240   : > { %1752 = vst.msk [vmem:[%s3059_s5] sm:$0x3] %vm1751_vm15, %v1750_v34 }
 0x241 PF: > { %s16_s22 = sadd.s32 1, %s2677_s22   ;;  %s3061_s18 = smov %s2665_s19 }
 0x242   : > { %p13_p8 = scmp.ge.s32.totalorder %s16_s22, 5   ;;  %s3062_s19 = smov %s2755_s27 }
 0x243   : > { %s3063_s20 = smov %s2673_s21  ;;  %s3064_s21 = smov %s3066_s23 }
 0x244   :  { %15 = sbr.rel (!%p13_p8) target bundleno = 3 (0x3), region = 375 }

</bundles_post_ra>
